<compile_context>
chip_gen: v6e
topology: v6e:2x2x1
jax: 0.10.0
libtpu: 0.0.40
codegen_flags: <defaults>
</compile_context>

<pallas_src>
import functools
import numpy as np
import jax
import jax.numpy as jnp
from jax.experimental import pallas as pl
from jax.experimental.pallas import tpu as pltpu


@functools.lru_cache(maxsize=None)
def _group_mean_matrix(C: int, groups: int = 3) -> np.ndarray:
    """G @ v == broadcast(group_mean(v)) for contiguous channel groups (reshape(3,4).mean)."""
    gsz = C // groups
    G = np.zeros((C, C), np.float32)
    for i in range(C):
        g = i // gsz
        G[i, g * gsz:(g + 1) * gsz] = 1.0 / gsz
    return G


def _channel_gate_kernel(x_ref, w1_ref, b1_ref, w2g_ref, b2g2_ref,
                         out_ref, scale_ref, *, inv_hw, hw_valid, hw_pad):
    # x block: (Nb, C, HWp) in the input dtype. Spatial on lanes, channels on sublanes.
    x = x_ref[...]

    # Global average / max pooling over the spatial (lane) axis; stats promoted to f32.
    # Padded lanes are zero, so the sum over the padded axis equals the valid sum.
    avg = jnp.sum(x, axis=2, keepdims=True, dtype=jnp.float32) * inv_hw      # (Nb, C, 1)
    if hw_valid != hw_pad:
        lane = jax.lax.broadcasted_iota(jnp.int32, (1, 1, hw_pad), 2)
        xm = jnp.where(lane < hw_valid, x, jnp.asarray(-jnp.inf, x.dtype))
    else:
        xm = x
    mx = jnp.max(xm, axis=2, keepdims=True).astype(jnp.float32)              # (Nb, C, 1)

    w1 = w1_ref[...]       # (C, 1) f32   first Linear weight (hidden == 1)
    b1 = b1_ref[...]       # (1, 1) f32   first Linear bias
    w2g = w2g_ref[...]     # (C, 1) f32   G @ W2
    b2g2 = b2g2_ref[...]   # (C, 1) f32   2 * (G @ b2)

    # hidden == 1 shared MLP entirely on VPU/XLU (no MXU): per-sample scalar hidden unit.
    h_avg = jnp.maximum(jnp.sum(avg * w1, axis=1, keepdims=True) + b1, 0.0)  # (Nb, 1, 1)
    h_max = jnp.maximum(jnp.sum(mx * w1, axis=1, keepdims=True) + b1, 0.0)   # (Nb, 1, 1)

    # att == G @ (mlp(avg) + mlp(max))  (group-mean folded into w2g / b2g2).
    att = w2g * (h_avg + h_max) + b2g2                                       # (Nb, C, 1)
    scale = jax.nn.sigmoid(att)                                              # f32

    out_ref[...] = (x * scale).astype(out_ref.dtype)        # lane-broadcast multiply
    scale_ref[...] = scale.astype(scale_ref.dtype)          # tiny (Nb, C, 1) gate


@jax.jit
def channel_gate_forward(x, w1, b1, w2, b2):
    """x: (N, C, H, W); PyTorch-layout params w1:(hidden,C), b1:(hidden,), w2:(C,hidden),
       b2:(C,). Returns (x * scale, scale) with scale broadcast to x.shape."""
    N, C, H, W = x.shape
    assert C == 12, "ChannelGate reshapes attention to (N, 3, 4) => gate_channels == 12"
    hidden = w1.shape[0]
    assert hidden == 1, "reduction_ratio == 12 with C == 12 => hidden == 1"
    HW = H * W
    dtype = x.dtype
    itemsize = np.dtype(dtype).itemsize

    # Lane-dense stores: pad the flattened spatial axis to a multiple of 128.
    HWp = ((HW + 127) // 128) * 128

    # Samples per grid step: amortize per-step overhead, keep blocks modest, and keep
    # at least 2 grid steps so v7x's two TensorCores both get work.
    bytes_per_sample = C * HWp * itemsize
    nb = 1
    while (nb * 2 * bytes_per_sample <= (1 << 20)) and (N >= nb * 4):
        nb *= 2
    Np = ((N + nb - 1) // nb) * nb

    x3 = x.reshape(N, C, HW)
    if Np != N or HWp != HW:
        x3 = jnp.pad(x3, ((0, Np - N), (0, 0), (0, HWp - HW)))

    # Fold the constant group-mean operator G into the second Linear (host-side, cached).
    G = jnp.asarray(_group_mean_matrix(C))                          # (C, C)
    w2g = (G @ w2.astype(jnp.float32).reshape(C, hidden)).reshape(C, 1)
    b2g2 = 2.0 * (G @ b2.astype(jnp.float32).reshape(C, 1))         # both mlp branches add b2
    w1f = w1.astype(jnp.float32).reshape(C, 1)
    b1f = b1.astype(jnp.float32).reshape(1, 1)

    kernel = functools.partial(_channel_gate_kernel,
                               inv_hw=1.0 / HW, hw_valid=HW, hw_pad=HWp)

    # Only raise the scoped-VMEM limit when the (double-buffered in + out) blocks need it;
    # cap at 64 MiB (v7x physical per-TensorCore VMEM).
    block_bytes = nb * C * HWp * itemsize
    vmem_needed = 4 * block_bytes + (4 << 20)
    compiler_kwargs = dict(dimension_semantics=("parallel",))
    if vmem_needed > (16 << 20):
        compiler_kwargs["vmem_limit_bytes"] = int(min(vmem_needed, 64 << 20))

    out, gate = pl.pallas_call(
        kernel,
        out_shape=(jax.ShapeDtypeStruct((Np, C, HWp), dtype),   # x * scale
                   jax.ShapeDtypeStruct((Np, C, 1), dtype)),    # per-(sample, channel) gate
        grid=(Np // nb,),
        in_specs=[
            pl.BlockSpec((nb, C, HWp), lambda n: (n, 0, 0)),    # x, nb samples per step
            pl.BlockSpec((C, 1), lambda n: (0, 0)),             # W1 (resident)
            pl.BlockSpec((1, 1), lambda n: (0, 0)),             # b1
            pl.BlockSpec((C, 1), lambda n: (0, 0)),             # G @ W2
            pl.BlockSpec((C, 1), lambda n: (0, 0)),             # 2 * G @ b2
        ],
        out_specs=(
            pl.BlockSpec((nb, C, HWp), lambda n: (n, 0, 0)),
            pl.BlockSpec((nb, C, 1), lambda n: (n, 0, 0)),
        ),
        compiler_params=pltpu.CompilerParams(**compiler_kwargs),
    )(x3, w1f, b1f, w2g, b2g2)

    out = out[:N, :, :HW].reshape(N, C, H, W)
    scale = jnp.broadcast_to(gate[:N].reshape(N, C, 1, 1), (N, C, H, W))
    return out, scale


def _channel_gate_reference(x, w1, b1, w2, b2):
    """Pure-JAX reference mirroring the PyTorch module exactly."""
    N, C, H, W = x.shape
    avg = jnp.mean(x, axis=(2, 3))
    mx = jnp.max(x, axis=(2, 3))

    def mlp(p):
        h = jnp.maximum(p @ w1.T + b1, 0.0)
        return h @ w2.T + b2

    att = mlp(avg) + mlp(mx)
    att = att.reshape(N, 3, 4)
    aw = jnp.mean(att, axis=2, keepdims=True)
    aw = jnp.broadcast_to(aw, (N, 3, 4)).reshape(N, C)
    scale = jax.nn.sigmoid(aw)[:, :, None, None]
    scale = jnp.broadcast_to(scale, x.shape)
    return x * scale, scale


if __name__ == "__main__":
    N, C, H, W = 4, 12, 16, 16          # gate_channels = 12 (required by the module)
    reduction_ratio = 12
    hidden = C // reduction_ratio       # = 1

    key = jax.random.PRNGKey(0)
    kx, k1, kb1, k2, kb2 = jax.random.split(key, 5)

    x = jax.random.normal(kx, (N, C, H, W), dtype=jnp.float32)

    # nn.Linear default init bounds (uniform +-1/sqrt(fan_in)), deterministic here.
    bound1 = 1.0 / np.sqrt(C)
    w1 = jax.random.uniform(k1, (hidden, C), jnp.float32, -bound1, bound1)
    b1 = jax.random.uniform(kb1, (hidden,), jnp.float32, -bound1, bound1)
    bound2 = 1.0 / np.sqrt(hidden)
    w2 = jax.random.uniform(k2, (C, hidden), jnp.float32, -bound2, bound2)
    b2 = jax.random.uniform(kb2, (C,), jnp.float32, -bound2, bound2)

    out, scale = channel_gate_forward(x, w1, b1, w2, b2)
    out = jax.block_until_ready(out)
    scale = jax.block_until_ready(scale)

    assert out.shape == (N, C, H, W) and scale.shape == (N, C, H, W)
    assert bool(jnp.all(jnp.isfinite(out))) and bool(jnp.all(jnp.isfinite(scale)))

    ref_out, ref_scale = _channel_gate_reference(x, w1, b1, w2, b2)
    np.testing.assert_allclose(np.asarray(out), np.asarray(ref_out), rtol=1e-4, atol=1e-5)
    np.testing.assert_allclose(np.asarray(scale), np.asarray(ref_scale), rtol=1e-4, atol=1e-5)

    print("KERNEL_OK")
</pallas_src>

<mosaic_0001>
module attributes {stable_mosaic.version = 11 : i64} {
  func.func @_channel_gate_kernel(%arg0: i32, %arg1: memref<2x12x256xf32, #tpu.memory_space<vmem>>, %arg2: memref<12x1xf32, #tpu.memory_space<vmem>>, %arg3: memref<1x1xf32, #tpu.memory_space<vmem>>, %arg4: memref<12x1xf32, #tpu.memory_space<vmem>>, %arg5: memref<12x1xf32, #tpu.memory_space<vmem>>, %arg6: memref<2x12x256xf32, #tpu.memory_space<vmem>>, %arg7: memref<2x12x1xf32, #tpu.memory_space<vmem>>) attributes {dimension_semantics = [#tpu.dimension_semantics<parallel>], iteration_bounds = array<i64: 2>, scalar_prefetch = 0 : i64, scratch_operands = 0 : i64, tpu.core_type = #tpu.core_type<tc>, window_params = [{transform_indices = @transform_0, window_bounds = array<i64: 2, 12, 256>}, {pipeline_mode = #tpu.pipeline_mode<synchronous>, transform_indices = @transform_1, window_bounds = array<i64: 12, 1>}, {pipeline_mode = #tpu.pipeline_mode<synchronous>, transform_indices = @transform_2, window_bounds = array<i64: 1, 1>}, {pipeline_mode = #tpu.pipeline_mode<synchronous>, transform_indices = @transform_3, window_bounds = array<i64: 12, 1>}, {pipeline_mode = #tpu.pipeline_mode<synchronous>, transform_indices = @transform_4, window_bounds = array<i64: 12, 1>}, {transform_indices = @transform_5, window_bounds = array<i64: 2, 12, 256>}, {transform_indices = @transform_6, window_bounds = array<i64: 2, 12, 1>}]} {
    %c0 = arith.constant 0 : index
    %c0_0 = arith.constant 0 : index
    %c0_1 = arith.constant 0 : index
    %0 = vector.load %arg1[%c0, %c0_0, %c0_1] : memref<2x12x256xf32, #tpu.memory_space<vmem>>, vector<2x12x256xf32>
    %cst = arith.constant dense<0.000000e+00> : vector<2x12xf32>
    %1 = vector.multi_reduction <add>, %0, %cst [2] : vector<2x12x256xf32> to vector<2x12xf32>
    %2 = vector.shape_cast %1 : vector<2x12xf32> to vector<2x12x1xf32>
    %cst_2 = arith.constant 3.906250e-03 : f32
    %3 = vector.broadcast %cst_2 : f32 to vector<2x12x1xf32>
    %4 = arith.mulf %2, %3 : vector<2x12x1xf32>
    %cst_3 = arith.constant dense<0xFF800000> : vector<2x12xf32>
    %5 = vector.multi_reduction <maximumf>, %0, %cst_3 [2] : vector<2x12x256xf32> to vector<2x12xf32>
    %6 = vector.shape_cast %5 : vector<2x12xf32> to vector<2x12x1xf32>
    %c0_4 = arith.constant 0 : index
    %c0_5 = arith.constant 0 : index
    %7 = vector.load %arg2[%c0_4, %c0_5] : memref<12x1xf32, #tpu.memory_space<vmem>>, vector<12x1xf32>
    %c0_6 = arith.constant 0 : index
    %c0_7 = arith.constant 0 : index
    %8 = vector.load %arg3[%c0_6, %c0_7] : memref<1x1xf32, #tpu.memory_space<vmem>>, vector<1x1xf32>
    %c0_8 = arith.constant 0 : index
    %c0_9 = arith.constant 0 : index
    %9 = vector.load %arg4[%c0_8, %c0_9] : memref<12x1xf32, #tpu.memory_space<vmem>>, vector<12x1xf32>
    %c0_10 = arith.constant 0 : index
    %c0_11 = arith.constant 0 : index
    %10 = vector.load %arg5[%c0_10, %c0_11] : memref<12x1xf32, #tpu.memory_space<vmem>>, vector<12x1xf32>
    %11 = vector.shape_cast %7 : vector<12x1xf32> to vector<1x12x1xf32>
    %12 = vector.broadcast %11 : vector<1x12x1xf32> to vector<2x12x1xf32>
    %13 = arith.mulf %4, %12 : vector<2x12x1xf32>
    %cst_12 = arith.constant dense<0.000000e+00> : vector<2x1xf32>
    %14 = vector.multi_reduction <add>, %13, %cst_12 [1] : vector<2x12x1xf32> to vector<2x1xf32>
    %15 = vector.shape_cast %14 : vector<2x1xf32> to vector<2x1x1xf32>
    %16 = vector.shape_cast %8 : vector<1x1xf32> to vector<1x1x1xf32>
    %17 = vector.broadcast %16 : vector<1x1x1xf32> to vector<2x1x1xf32>
    %18 = arith.addf %15, %17 : vector<2x1x1xf32>
    %cst_13 = arith.constant 0.000000e+00 : f32
    %19 = vector.broadcast %cst_13 : f32 to vector<2x1x1xf32>
    %20 = arith.maximumf %18, %19 : vector<2x1x1xf32>
    %21 = vector.shape_cast %7 : vector<12x1xf32> to vector<1x12x1xf32>
    %22 = vector.broadcast %21 : vector<1x12x1xf32> to vector<2x12x1xf32>
    %23 = arith.mulf %6, %22 : vector<2x12x1xf32>
    %cst_14 = arith.constant dense<0.000000e+00> : vector<2x1xf32>
    %24 = vector.multi_reduction <add>, %23, %cst_14 [1] : vector<2x12x1xf32> to vector<2x1xf32>
    %25 = vector.shape_cast %24 : vector<2x1xf32> to vector<2x1x1xf32>
    %26 = vector.shape_cast %8 : vector<1x1xf32> to vector<1x1x1xf32>
    %27 = vector.broadcast %26 : vector<1x1x1xf32> to vector<2x1x1xf32>
    %28 = arith.addf %25, %27 : vector<2x1x1xf32>
    %cst_15 = arith.constant 0.000000e+00 : f32
    %29 = vector.broadcast %cst_15 : f32 to vector<2x1x1xf32>
    %30 = arith.maximumf %28, %29 : vector<2x1x1xf32>
    %31 = arith.addf %20, %30 : vector<2x1x1xf32>
    %32 = vector.shape_cast %9 : vector<12x1xf32> to vector<1x12x1xf32>
    %33 = vector.broadcast %32 : vector<1x12x1xf32> to vector<2x12x1xf32>
    %34 = vector.broadcast %31 : vector<2x1x1xf32> to vector<2x12x1xf32>
    %35 = arith.mulf %33, %34 : vector<2x12x1xf32>
    %36 = vector.shape_cast %10 : vector<12x1xf32> to vector<1x12x1xf32>
    %37 = vector.broadcast %36 : vector<1x12x1xf32> to vector<2x12x1xf32>
    %38 = arith.addf %35, %37 : vector<2x12x1xf32>
    %39 = arith.negf %38 : vector<2x12x1xf32>
    %40 = math.exp %39 : vector<2x12x1xf32>
    %cst_16 = arith.constant 1.000000e+00 : f32
    %41 = vector.broadcast %cst_16 : f32 to vector<2x12x1xf32>
    %42 = arith.addf %41, %40 : vector<2x12x1xf32>
    %43 = arith.divf %41, %42 : vector<2x12x1xf32>
    %44 = vector.broadcast %43 : vector<2x12x1xf32> to vector<2x12x256xf32>
    %45 = arith.mulf %0, %44 : vector<2x12x256xf32>
    %c0_17 = arith.constant 0 : index
    %c0_18 = arith.constant 0 : index
    %c0_19 = arith.constant 0 : index
    %46 = vector.load %arg6[%c0_17, %c0_18, %c0_19] : memref<2x12x256xf32, #tpu.memory_space<vmem>>, vector<2x12x256xf32>
    tpu.vector_store %arg6[%c0_17, %c0_18, %c0_19], %45 {strides = array<i32>} : memref<2x12x256xf32, #tpu.memory_space<vmem>>, vector<2x12x256xf32>,
    %c0_20 = arith.constant 0 : index
    %c0_21 = arith.constant 0 : index
    %c0_22 = arith.constant 0 : index
    %47 = vector.load %arg7[%c0_20, %c0_21, %c0_22] : memref<2x12x1xf32, #tpu.memory_space<vmem>>, vector<2x12x1xf32>
    tpu.vector_store %arg7[%c0_20, %c0_21, %c0_22], %43 {strides = array<i32>} : memref<2x12x1xf32, #tpu.memory_space<vmem>>, vector<2x12x1xf32>,
    return
  }
  func.func @transform_0(%arg0: i32) -> (i32, i32, i32) {
    %c0_i32 = arith.constant 0 : i32
    %c0_i32_0 = arith.constant 0 : i32
    %c0_i32_1 = arith.constant 0 : i32
    return %arg0, %c0_i32, %c0_i32_0 : i32, i32, i32
  }
  func.func @transform_1(%arg0: i32) -> (i32, i32) {
    %c0_i32 = arith.constant 0 : i32
    %c0_i32_0 = arith.constant 0 : i32
    %c0_i32_1 = arith.constant 0 : i32
    return %c0_i32, %c0_i32_0 : i32, i32
  }
  func.func @transform_2(%arg0: i32) -> (i32, i32) {
    %c0_i32 = arith.constant 0 : i32
    %c0_i32_0 = arith.constant 0 : i32
    %c0_i32_1 = arith.constant 0 : i32
    return %c0_i32, %c0_i32_0 : i32, i32
  }
  func.func @transform_3(%arg0: i32) -> (i32, i32) {
    %c0_i32 = arith.constant 0 : i32
    %c0_i32_0 = arith.constant 0 : i32
    %c0_i32_1 = arith.constant 0 : i32
    return %c0_i32, %c0_i32_0 : i32, i32
  }
  func.func @transform_4(%arg0: i32) -> (i32, i32) {
    %c0_i32 = arith.constant 0 : i32
    %c0_i32_0 = arith.constant 0 : i32
    %c0_i32_1 = arith.constant 0 : i32
    return %c0_i32, %c0_i32_0 : i32, i32
  }
  func.func @transform_5(%arg0: i32) -> (i32, i32, i32) {
    %c0_i32 = arith.constant 0 : i32
    %c0_i32_0 = arith.constant 0 : i32
    %c0_i32_1 = arith.constant 0 : i32
    return %arg0, %c0_i32, %c0_i32_0 : i32, i32, i32
  }
  func.func @transform_6(%arg0: i32) -> (i32, i32, i32) {
    %c0_i32 = arith.constant 0 : i32
    %c0_i32_0 = arith.constant 0 : i32
    %c0_i32_1 = arith.constant 0 : i32
    return %arg0, %c0_i32, %c0_i32_0 : i32, i32, i32
  }
}

</mosaic_0001>

<bundles_post_ra>
// kernel: channel_gate_forward.1
= control target key start
LH: loop header
LB: loop body
LE: loop exit
PB: predicated region body
PF: predicated region fallthrough
CT: control target
= control target key end

     0   :  { %s657_s23 = smov 0   ;;  %s763_s0 = inlined_call_operand.vmem [shape: f32[4,12,256], index: 0, kind: input, shape index: {}]   ;;  %s764_s1 = inlined_call_operand.vmem [shape: f32[12,1], index: 1, kind: input, shape index: {}]   ;;  %s765_s2 = inlined_call_operand.<no memory space> [shape: f32[1,1], index: 2, kind: input, shape index: {}]   ;;  %s766_s3 = inlined_call_operand.vmem [shape: f32[12,1], index: 3, kind: input, shape index: {}]   ;;  %s767_s4 = inlined_call_operand.vmem [shape: f32[12,1], index: 4, kind: input, shape index: {}]   ;;  %s768_s5 = inlined_call_operand.vmem [shape: f32[4,12,256], index: 5, kind: output, shape index: {0}]   ;;  %s769_s6 = inlined_call_operand.vmem [shape: f32[4,12,1], index: 6, kind: output, shape index: {1}]  }
   0x1   :  { %v12_v0 = vstv %s765_s2 }
   0x2   :  { %13 = vst [vmem:[#allocation2] sm:$0x1] %v12_v0 }
   0x3 LB: > { %s560_s24 = sadd.s32 4294967295, %s616_s23   ;;  %p564_p0 = scmp.ge.s32.totalorder %s616_s23, 1  ;;  %s616_s23 = sphi %s657_s23, %s19_s23  }
   0x4   : > { %p219_p1 = scmp.lt.s32.totalorder %s616_s23, 3 }
   0x6   : > { %p220_p2 = pnand %p564_p0, %p219_p1 }
   0x7   : > { %s565_s25 = sshll.u32 (!%p220_p2), %s560_s24, 1 }
   0x8   : > { %223 = sbr.rel (%p220_p2) target bundleno = 365 (0x16d), region = 40  ;;  %p258_p3 = scmp.lt.s32.totalorder (!%p220_p2), %s565_s25, 3 }
   0xd   : > { %s771_s25 = smov (!%p258_p3, %s565_s25), 3  ;;  %vm289_vm0 = vcmask 1043456   ;;  %v618_v25 = vmov 0   ;;  %v323_v29 = vld [vmem:[%s764_s1] sm:$0xff]  ;;  %v324_v30 = vld [vmem:[%s764_s1 + $0x8] sm:$0xf] }
   0xe   : > { %s580_s2 = sshll.u32 %s771_s25, 5  ;;  %593 = vset.pattern.permute.xlu1 %v618_v25  ;;  %592 = vset.pattern.permute.xlu0 %v618_v25  ;;  %vm336_vm1 = vcmask 3072   ;;  %vm334_vm2 = vcmask 7168   ;;  %s582_s17 = sshll.u32 %s771_s25, 4 }
   0xf   : > { %s262_s28 = scalar_lea.vmem %s763_s0, %s580_s2  ;;  %s276_s20 = scalar_lea.vmem %s769_s6, %s582_s17 }
  0x10   : > { %v673_v1 = vld [vmem:[%s262_s28 + $0x20] sm:$0xff]  ;;  %v675_v2 = vld [vmem:[%s262_s28 + $0x28] sm:$0xff]  ;;  %v683_v6 = vld [vmem:[%s262_s28 + $0x30] sm:$0xf]  ;;  %s269_s24 = scalar_lea.vmem %s768_s5, %s580_s2 }
  0x11   : > { %v677_v3 = vld [vmem:[%s262_s28] sm:$0xff]  ;;  %v295_v4 = vadd.f32 %v675_v2, %v673_v1  ;;  %v681_v5 = vld [vmem:[%s262_s28 + $0x8] sm:$0xff]  ;;  %v685_v7 = vld [vmem:[%s262_s28 + $0x38] sm:$0xf]  ;;  %v298_v9 = vsel %vm289_vm0, %v683_v6, 0.0  ;;  %v318_v21 = vsel %vm289_vm0, %v683_v6, -inf  ;;  %v315_v24 = vmax.f32 %v673_v1, %v675_v2 }
  0x12   : > { %v286_v8 = vadd.f32 %v681_v5, %v677_v3  ;;  %v299_v10 = vsel %vm289_vm0, %v685_v7, 0.0  ;;  %v693_v11 = vld [vmem:[%s262_s28 + $0x10] sm:$0xf]  ;;  %v695_v12 = vld [vmem:[%s262_s28 + $0x18] sm:$0xf]  ;;  %v307_v14 = vmax.f32 %v677_v3, %v681_v5  ;;  %v319_v22 = vsel %vm289_vm0, %v685_v7, -inf }
  0x13   : > { %296 = vadd.xlane.f32.xlu1 %v295_v4  ;;  %v300_v13 = vadd.f32 %v299_v10, %v298_v9  ;;  %v310_v15 = vsel %vm289_vm0, %v693_v11, -inf  ;;  %v311_v16 = vsel %vm289_vm0, %v695_v12, -inf  ;;  %v290_v17 = vsel %vm289_vm0, %v693_v11, 0.0 }
  0x14   : > { %287 = vadd.xlane.f32.xlu0 %v286_v8  ;;  %v291_v18 = vsel %vm289_vm0, %v695_v12, 0.0  ;;  %v312_v19 = vmax.f32 %v310_v15, %v311_v16  ;;  %v320_v23 = vmax.f32 %v318_v21, %v319_v22 }
  0x15   : > { %v292_v20 = vadd.f32 %v291_v18, %v290_v17 }
  0x17   : > { %301 = vadd.xlane.f32.xlu1 %v300_v13 }
  0x18   : > { %308 = vmax.xlane.f32.xlu0 %v307_v14 }
  0x1b   : > { %313 = vmax.xlane.f32.xlu1 %v312_v19  ;;  %v386_v19 = vlaneseq }
  0x1c   : > { %293 = vadd.xlane.f32.xlu0 %v292_v20 }
  0x1f   : > { %321 = vmax.xlane.f32.xlu1 %v320_v23 }
  0x20   : > { %316 = vmax.xlane.f32.xlu0 %v315_v24 }
  0x9c   : > { %v297_v26 = vpop.xlane.xlu1 %296 }
  0x9d   : > { %v305_v27 = vmul.f32 0.00390625, %v297_v26  ;;  %v288_v28 = vpop.xlane.xlu0 %287  ;;  %v325_v26 = vld [vmem:[#allocation2] sm:$0x1] }
  0x9e   : > { %v303_v33 = vmul.f32 0.00390625, %v288_v28  ;;  %v387_v28 = vshrl.u32 %v386_v19, 7 }
  0x9f   : > { %v332_v32 = vmul.f32 %v323_v29, %v305_v27 }
  0xa0   : > { %v302_v31 = vpop.xlane.xlu1 %301  ;;  %v330_v40 = vmul.f32 %v323_v29, %v303_v33 }
  0xa1   : > { %v306_v34 = vmul.f32 0.00390625, %v302_v31  ;;  %v309_v35 = vpop.xlane.xlu0 %308  ;;  %v345_v39 = vsel %vm334_vm2, %v332_v32, 0.0 }
  0xa2   : > { %v358_v37 = vmul.f32 %v323_v29, %v309_v35  ;;  %v335_v52 = vsel %vm334_vm2, %v330_v40, 0.0  ;;  %v388_v35 = vsub.s32 0, %v387_v28 }
  0xa3   : > { %v333_v36 = vmul.f32 %v324_v30, %v306_v34 }
  0xa4   : > { %v314_v38 = vpop.xlane.xlu1 %313  ;;  %v362_v46 = vsel %vm334_vm2, %v358_v37, 0.0 }
  0xa5   : > { %v346_v41 = vsel %vm336_vm1, %v333_v36, 0.0  ;;  %v359_v42 = vmul.f32 %v324_v30, %v314_v38  ;;  %v294_v43 = vpop.xlane.xlu0 %293 }
  0xa6   : > { %v347_v44 = vadd.f32 %v346_v41, %v345_v39  ;;  %v304_v45 = vmul.f32 0.00390625, %v294_v43  ;;  %v326_v41 = vld [vmem:[%s766_s3] sm:$0xff] }
  0xa7   : > { %v363_v47 = vsel %vm336_vm1, %v359_v42, 0.0  ;;  %v327_v42 = vld [vmem:[%s766_s3 + $0x8] sm:$0xf] }
  0xa8   : > { %v348_v48 = vrot.slane %v347_v44, 4  ;;  %v364_v49 = vadd.f32 %v363_v47, %v362_v46  ;;  %v331_v50 = vmul.f32 %v324_v30, %v304_v45  ;;  %v322_v51 = vpop.xlane.xlu1 %321  ;;  %v328_v45 = vld [vmem:[%s767_s4] sm:$0xff]  ;;  %v329_v46 = vld [vmem:[%s767_s4 + $0x8] sm:$0xf] }
  0xa9   : > { %v361_v53 = vmul.f32 %v324_v30, %v322_v51  ;;  %v317_v54 = vpop.xlane.xlu0 %316 }
  0xaa   : > { %v349_v55 = vadd.f32 %v348_v48, %v347_v44  ;;  %v365_v56 = vrot.slane %v364_v49, 4  ;;  %v337_v57 = vsel %vm336_vm1, %v331_v50, 0.0  ;;  %v360_v58 = vmul.f32 %v323_v29, %v317_v54 }
  0xab   : > { %v338_v59 = vadd.f32 %v337_v57, %v335_v52  ;;  %v372_v60 = vsel %vm336_vm1, %v361_v53, 0.0 }
  0xac   : > { %v350_v61 = vrot.slane %v349_v55, 2  ;;  %v366_v62 = vadd.f32 %v365_v56, %v364_v49  ;;  %v371_v63 = vsel %vm334_vm2, %v360_v58, 0.0 }
  0xad   : > { %v339_v0 = vrot.slane %v338_v59, 4  ;;  %v373_v4 = vadd.f32 %v372_v60, %v371_v63 }
  0xae   : > { %v351_v8 = vadd.f32 %v350_v61, %v349_v55  ;;  %v367_v9 = vrot.slane %v366_v62, 2 }
  0xaf   : > { %v340_v10 = vadd.f32 %v339_v0, %v338_v59  ;;  %v374_v13 = vrot.slane %v373_v4, 4 }
  0xb0   : > { %v368_v14 = vadd.f32 %v367_v9, %v366_v62  ;;  %v352_v15 = vrot.slane %v351_v8, 1 }
  0xb1   : > { %v341_v16 = vrot.slane %v340_v10, 2  ;;  %v375_v17 = vadd.f32 %v374_v13, %v373_v4 }
  0xb2   : > { %v369_v18 = vrot.slane %v368_v14, 1  ;;  %v353_v23 = vadd.f32 %v352_v15, %v351_v8 }
  0xb3   : > { %v342_v20 = vadd.f32 %v341_v16, %v340_v10  ;;  %v376_v21 = vrot.slane %v375_v17, 2 }
  0xb4   : > { %v370_v22 = vadd.f32 %v369_v18, %v368_v14  ;;  %v355_v31 = vadd.f32 %v353_v23, %v325_v26 }
  0xb5   : > { %v343_v24 = vrot.slane %v342_v20, 1  ;;  %v377_v25 = vadd.f32 %v376_v21, %v375_v17 }
  0xb6   : > { %v380_v27 = vadd.f32 %v370_v22, %v325_v26  ;;  %v357_v38 = vmax.f32 %v355_v31, 0.0 }
  0xb7   : > { %v344_v29 = vadd.f32 %v343_v24, %v342_v20  ;;  %v378_v30 = vrot.slane %v377_v25, 1 }
  0xb8   : > { %v382_v34 = vmax.f32 %v380_v27, 0.0 }
  0xb9   : > { %v354_v32 = vadd.f32 %v344_v29, %v325_v26  ;;  %v379_v33 = vadd.f32 %v378_v30, %v377_v25 }
  0xbb   : > { %v356_v36 = vmax.f32 %v354_v32, 0.0  ;;  %v381_v37 = vadd.f32 %v379_v33, %v325_v26 }
  0xbd   : > { %v384_v39 = vadd.f32 %v382_v34, %v356_v36  ;;  %v383_v40 = vmax.f32 %v381_v37, 0.0 }
  0xbf   : > { %v389_v43 = vrot.slane %v384_v39, %v388_v35  ;;  %v385_v44 = vadd.f32 %v383_v40, %v357_v38 }
  0xc1   : > { %v394_v47 = vmul.f32 %v389_v43, %v326_v41  ;;  %v395_v48 = vmul.f32 %v389_v43, %v327_v42  ;;  %v393_v49 = vrot.slane %v385_v44, %v388_v35 }
  0xc3   : > { %v398_v50 = vadd.f32 %v394_v47, %v328_v45  ;;  %v399_v51 = vadd.f32 %v395_v48, %v329_v46  ;;  %v396_v52 = vmul.f32 %v393_v49, %v326_v41  ;;  %v397_v53 = vmul.f32 %v393_v49, %v327_v42 }
  0xc5   : > { %v574_v54 = vmul.f32 -1.442695, %v398_v50  ;;  %v575_v55 = vmul.f32 -1.442695, %v399_v51  ;;  %v400_v56 = vadd.f32 %v396_v52, %v328_v45  ;;  %v401_v57 = vadd.f32 %v397_v53, %v329_v46 }
  0xc7   : > { %594 = vpow2.f32 %v574_v54  ;;  %v576_v58 = vmul.f32 -1.442695, %v400_v56  ;;  %v577_v59 = vmul.f32 -1.442695, %v401_v57 }
  0xc8   : > { %596 = vpow2.f32 %v575_v55 }
  0xc9   : > { %598 = vpow2.f32 %v576_v58 }
  0xca   : > { %600 = vpow2.f32 %v577_v59 }
  0xd4   : > { %v595_v60 = vpop.eup %594 }
  0xd5   : > { %v597_v61 = vpop.eup %596  ;;  %v414_v62 = vadd.f32 1.0, %v595_v60 }
  0xd6   : > { %v599_v63 = vpop.eup %598  ;;  %v415_v0 = vadd.f32 1.0, %v597_v61 }
  0xd7   : > { %v601_v4 = vpop.eup %600  ;;  %602 = vrcp.f32 %v414_v62  ;;  %v416_v8 = vadd.f32 1.0, %v599_v63 }
  0xd8   : > { %604 = vrcp.f32 %v415_v0  ;;  %v417_v9 = vadd.f32 1.0, %v601_v4 }
  0xd9   : > { %606 = vrcp.f32 %v416_v8 }
  0xda   : > { %608 = vrcp.f32 %v417_v9 }
  0xe4   : > { %v603_v10 = vpop.eup %602 }
  0xe5   : > { %v605_v13 = vpop.eup %604  ;;  %462 = vst.msk [vmem:[%s276_s20] sm:$0xff] %vm334_vm2, %v603_v10  ;;  %428 = vperm.xlu0 %592, %v603_v10  }
  0xe6   : > { %v607_v14 = vpop.eup %606  ;;  %463 = vst.msk [vmem:[%s276_s20 + $0x8] sm:$0xf] %vm336_vm1, %v605_v13  ;;  %433 = vperm.xlu1 %593, %v605_v13  }
  0xe7   : > { %v609_v15 = vpop.eup %608  ;;  %464 = vst.msk [vmem:[%s276_s20 + $0x10] sm:$0xff] %vm334_vm2, %v607_v14 }
  0xe8   : > { %465 = vst.msk [vmem:[%s276_s20 + $0x18] sm:$0xf] %vm336_vm1, %v609_v15 }
  0xea   : > { %438 = vperm.xlu1 %593, %v607_v14  }
  0xee   : > { %443 = vperm.xlu1 %593, %v609_v15  }
 0x160   : > { %v429_v16 = vpop.permute.xlu0 %428 }
 0x161   : > { %v434_v17 = vpop.permute.xlu1 %433  ;;  %v446_v18 = vmul.f32 %v429_v16, %v677_v3  ;;  %v447_v19 = vmul.f32 %v429_v16, %v681_v5 }
 0x162   : > { %v448_v20 = vmul.f32 %v434_v17, %v693_v11  ;;  %v449_v21 = vmul.f32 %v434_v17, %v695_v12 }
 0x163   : > { %454 = vst [vmem:[%s269_s24] sm:$0xff] %v446_v18  ;;  %455 = vst [vmem:[%s269_s24 + $0x8] sm:$0xff] %v447_v19 }
 0x164   : > { %456 = vst [vmem:[%s269_s24 + $0x10] sm:$0xf] %v448_v20  ;;  %457 = vst [vmem:[%s269_s24 + $0x18] sm:$0xf] %v449_v21 }
 0x165   : > { %v439_v22 = vpop.permute.xlu1 %438 }
 0x166   : > { %v450_v23 = vmul.f32 %v439_v22, %v673_v1  ;;  %v451_v24 = vmul.f32 %v439_v22, %v675_v2 }
 0x168   : > { %458 = vst [vmem:[%s269_s24 + $0x20] sm:$0xff] %v450_v23  ;;  %459 = vst [vmem:[%s269_s24 + $0x28] sm:$0xff] %v451_v24 }
 0x169   : > { %v444_v25 = vpop.permute.xlu1 %443 }
 0x16a   : > { %v452_v3 = vmul.f32 %v444_v25, %v683_v6  ;;  %v453_v5 = vmul.f32 %v444_v25, %v685_v7 }
 0x16c   : > { %460 = vst [vmem:[%s269_s24 + $0x30] sm:$0xf] %v452_v3  ;;  %461 = vst [vmem:[%s269_s24 + $0x38] sm:$0xf] %v453_v5 }
 0x16d PF: > { %s19_s23 = sadd.s32 1, %s616_s23  }
 0x16e   : > { %p16_p4 = scmp.ge.s32.totalorder %s19_s23, 4  }
 0x170   :  { %18 = sbr.rel (!%p16_p4) target bundleno = 3 (0x3), region = 82 }

</bundles_post_ra>
